<compile_context>
chip_gen: v5e
topology: v5e:2x2
jax: 0.10.0
libtpu: 0.0.40
codegen_flags: <defaults>
</compile_context>

<pallas_src>
import jax
import jax.numpy as jnp
from jax import lax
from jax.experimental import pallas as pl
from jax.experimental.pallas import tpu as pltpu


def _round_up(x, m):
    return (x + m - 1) // m * m


def _fertility_kernel(x_ref, w_ref, b_ref, o_ref):
    # x_ref: (TM, H)   w_ref: (Fp, H)  (PyTorch layout, contract on H)
    # b_ref: (1, Fp) f32   o_ref: (TM, Fp)
    acc = lax.dot_general(
        x_ref[...], w_ref[...],
        dimension_numbers=(((1,), (1,)), ((), ())),
        preferred_element_type=jnp.float32,
    )
    o_ref[...] = (acc + b_ref[...]).astype(o_ref.dtype)


def fertility_predictor(encoder_hidden, weight, bias):
    """encoder_hidden: (B, S, H)
    weight:          (F, H)   (PyTorch nn.Linear layout)
    bias:            (F,)
    returns          (B, S, F), same dtype as encoder_hidden
    """
    B, S, H = encoder_hidden.shape
    F = weight.shape[0]
    dtype = encoder_hidden.dtype
    itemsize = jnp.dtype(dtype).itemsize

    M = B * S
    Fp = _round_up(F, 128)                # lane-dense output block

    # ---- pick an M tile: big enough to pipeline (~512), small enough for VMEM ----
    buffer_budget = 32 * 1024 * 1024      # conservative across v5e/v6e/v7x
    w_bytes = Fp * H * itemsize
    b_bytes = Fp * 4
    per_row = 2 * H * itemsize + 2 * Fp * itemsize   # double-buffered x + out rows
    tm_fit = max(8, (buffer_budget - w_bytes - b_bytes) // max(per_row, 1))
    TM = int(min(512, _round_up(M, 8), (tm_fit // 8) * 8))
    TM = max(TM, 8)
    M_pad = _round_up(M, TM)

    # ---- operand prep: pad M and F with zeros; keep weight as (F, H) ----
    x2d = encoder_hidden.reshape(M, H)
    if M_pad != M:
        x2d = jnp.pad(x2d, ((0, M_pad - M), (0, 0)))
    w_p = weight.astype(dtype)
    if Fp != F:
        w_p = jnp.pad(w_p, ((0, Fp - F), (0, 0)))
    b_p = bias.astype(jnp.float32)
    if Fp != F:
        b_p = jnp.pad(b_p, (0, Fp - F))
    b_p = b_p.reshape(1, Fp)

    vmem_est = 2 * TM * H * itemsize + 2 * TM * Fp * itemsize + w_bytes + b_bytes
    vmem_limit = int(min(max(vmem_est + (4 << 20), 16 << 20), 48 << 20))

    grid = (M_pad // TM,)
    out2d = pl.pallas_call(
        _fertility_kernel,
        out_shape=jax.ShapeDtypeStruct((M_pad, Fp), dtype),
        grid=grid,
        in_specs=[
            pl.BlockSpec((TM, H), lambda i: (i, 0)),   # streamed activations
            pl.BlockSpec((Fp, H), lambda i: (0, 0)),   # weight, VMEM-resident
            pl.BlockSpec((1, Fp), lambda i: (0, 0)),   # bias, VMEM-resident
        ],
        out_specs=pl.BlockSpec((TM, Fp), lambda i: (i, 0)),
        compiler_params=pltpu.CompilerParams(
            dimension_semantics=("parallel",),
            vmem_limit_bytes=vmem_limit,
        ),
    )(x2d, w_p, b_p)

    return out2d[:M, :F].reshape(B, S, F)


if __name__ == "__main__":
    # Small shapes implied by the forward: (batch, seq, hidden) -> (batch, seq, max_fertility)
    batch, seq, hidden_size, max_fertility = 2, 8, 32, 10

    key = jax.random.PRNGKey(0)
    k_x, k_w, k_b = jax.random.split(key, 3)

    encoder_hidden = jax.random.normal(
        k_x, (batch, seq, hidden_size), dtype=jnp.float32)

    # PyTorch-like uniform(-1/sqrt(H), 1/sqrt(H)) init.
    bound = 1.0 / (hidden_size ** 0.5)
    weight = jax.random.uniform(k_w, (max_fertility, hidden_size),
                                minval=-bound, maxval=bound, dtype=jnp.float32)
    bias = jax.random.uniform(k_b, (max_fertility,),
                              minval=-bound, maxval=bound, dtype=jnp.float32)

    out = fertility_predictor(encoder_hidden, weight, bias)
    out = jax.block_until_ready(out)

    # Reference: nn.Linear semantics  y = x @ W.T + b
    ref = encoder_hidden @ weight.T + bias
    assert out.shape == (batch, seq, max_fertility)
    assert jnp.allclose(out, ref, atol=1e-5, rtol=1e-5)

    print("KERNEL_OK")
</pallas_src>

<mosaic_0001>
module attributes {stable_mosaic.version = 11 : i64} {
  func.func @_fertility_kernel(%arg0: i32, %arg1: memref<16x32xf32, #tpu.memory_space<vmem>>, %arg2: memref<128x32xf32, #tpu.memory_space<vmem>>, %arg3: memref<1x128xf32, #tpu.memory_space<vmem>>, %arg4: memref<16x128xf32, #tpu.memory_space<vmem>>) attributes {dimension_semantics = [#tpu.dimension_semantics<parallel>], iteration_bounds = array<i64: 1>, scalar_prefetch = 0 : i64, scratch_operands = 0 : i64, tpu.core_type = #tpu.core_type<tc>, window_params = [{transform_indices = @transform_0, window_bounds = array<i64: 16, 32>}, {pipeline_mode = #tpu.pipeline_mode<synchronous>, transform_indices = @transform_1, window_bounds = array<i64: 128, 32>}, {pipeline_mode = #tpu.pipeline_mode<synchronous>, transform_indices = @transform_2, window_bounds = array<i64: 1, 128>}, {transform_indices = @transform_3, window_bounds = array<i64: 16, 128>}]} {
    %c0 = arith.constant 0 : index
    %c0_0 = arith.constant 0 : index
    %0 = vector.load %arg1[%c0, %c0_0] : memref<16x32xf32, #tpu.memory_space<vmem>>, vector<16x32xf32>
    %c0_1 = arith.constant 0 : index
    %c0_2 = arith.constant 0 : index
    %1 = vector.load %arg2[%c0_1, %c0_2] : memref<128x32xf32, #tpu.memory_space<vmem>>, vector<128x32xf32>
    %cst = arith.constant dense<0.000000e+00> : vector<16x128xf32>
    %2 = tpu.matmul %0, %1, %cst {dimension_numbers = #tpu.dot_dimension_numbers<[1], [1], [0], [0], [0, 0, 1, 0], [], []>} : vector<16x32xf32>, vector<128x32xf32>, vector<16x128xf32> -> vector<16x128xf32>
    %c0_3 = arith.constant 0 : index
    %c0_4 = arith.constant 0 : index
    %3 = vector.load %arg3[%c0_3, %c0_4] : memref<1x128xf32, #tpu.memory_space<vmem>>, vector<1x128xf32>
    %4 = vector.broadcast %3 : vector<1x128xf32> to vector<16x128xf32>
    %5 = arith.addf %2, %4 : vector<16x128xf32>
    %c0_5 = arith.constant 0 : index
    %c0_6 = arith.constant 0 : index
    %6 = vector.load %arg4[%c0_5, %c0_6] : memref<16x128xf32, #tpu.memory_space<vmem>>, vector<16x128xf32>
    tpu.vector_store %arg4[%c0_5, %c0_6], %5 {strides = array<i32>} : memref<16x128xf32, #tpu.memory_space<vmem>>, vector<16x128xf32>,
    return
  }
  func.func @transform_0(%arg0: i32) -> (i32, i32) {
    %c0_i32 = arith.constant 0 : i32
    %c0_i32_0 = arith.constant 0 : i32
    return %arg0, %c0_i32 : i32, i32
  }
  func.func @transform_1(%arg0: i32) -> (i32, i32) {
    %c0_i32 = arith.constant 0 : i32
    %c0_i32_0 = arith.constant 0 : i32
    %c0_i32_1 = arith.constant 0 : i32
    return %c0_i32, %c0_i32_0 : i32, i32
  }
  func.func @transform_2(%arg0: i32) -> (i32, i32) {
    %c0_i32 = arith.constant 0 : i32
    %c0_i32_0 = arith.constant 0 : i32
    %c0_i32_1 = arith.constant 0 : i32
    return %c0_i32, %c0_i32_0 : i32, i32
  }
  func.func @transform_3(%arg0: i32) -> (i32, i32) {
    %c0_i32 = arith.constant 0 : i32
    %c0_i32_0 = arith.constant 0 : i32
    return %arg0, %c0_i32 : i32, i32
  }
}

</mosaic_0001>

<bundles_post_ra>
// kernel: tpu_custom_call.1
= control target key start
LH: loop header
LB: loop body
LE: loop exit
PB: predicated region body
PF: predicated region fallthrough
CT: control target
= control target key end

     0   :  { %vm37_vm0 = vcmask 261120   ;;  %s316_s0 = inlined_call_operand.vmem [shape: f32[16,32], index: 0, kind: input, shape index: {}]   ;;  %s317_s1 = inlined_call_operand.vmem [shape: f32[128,32], index: 1, kind: input, shape index: {}]   ;;  %s318_s2 = inlined_call_operand.vmem [shape: f32[1,128], index: 2, kind: input, shape index: {}]   ;;  %s319_s3 = inlined_call_operand.hbm [shape: f32[16,128], index: 3, kind: output, shape index: {}]  }
   0x1   :  { %v32_v0 = vld [vmem:[%s317_s1 + $0x78] sm:$0xff]  ;;  %v31_v1 = vld [vmem:[%s317_s1 + $0x70] sm:$0xff] }
   0x2   :  { %135 = vmatpush.xpose.msk.msra.mxu0 %vm37_vm0, %v32_v0  ;;  %153 = vmatpush.xpose.msk.msra.mxu1 %vm37_vm0, %v32_v0 }
   0x3   :  { %8 = vsyncpa [#allocation3], 0  ;;  %v30_v2 = vld [vmem:[%s317_s1 + $0x68] sm:$0xff]  ;;  %v29_v3 = vld [vmem:[%s317_s1 + $0x60] sm:$0xff]  ;;  %s123_s26 = sshll.u32 %s319_s3, 4  ;;  %s201_s27 = smov 8   ;;  %s124_s26 = int_to_ptr.hbm [resolvable:$true] %s123_s26 }
   0x4   :  { %v28_v4 = vld [vmem:[%s317_s1 + $0x58] sm:$0xff]  ;;  %v27_v5 = vld [vmem:[%s317_s1 + $0x50] sm:$0xff]  ;;  %v26_v6 = vld [vmem:[%s317_s1 + $0x48] sm:$0xff] }
   0x5   :  { %v25_v7 = vld [vmem:[%s317_s1 + $0x40] sm:$0xff]  ;;  %v24_v8 = vld [vmem:[%s317_s1 + $0x38] sm:$0xff]  ;;  %v23_v9 = vld [vmem:[%s317_s1 + $0x30] sm:$0xff] }
   0x6   :  { %136 = vmatpush.xpose.msk.msra.mxu0 %vm37_vm0, %v31_v1  ;;  %154 = vmatpush.xpose.msk.msra.mxu1 %vm37_vm0, %v31_v1  ;;  %v22_v10 = vld [vmem:[%s317_s1 + $0x28] sm:$0xff]  ;;  %v21_v11 = vld [vmem:[%s317_s1 + $0x20] sm:$0xff]  ;;  %v20_v12 = vld [vmem:[%s317_s1 + $0x18] sm:$0xff] }
   0x7   :  { %v19_v13 = vld [vmem:[%s317_s1 + $0x10] sm:$0xff]  ;;  %v18_v14 = vld [vmem:[%s317_s1 + $0x8] sm:$0xff]  ;;  %v17_v15 = vld [vmem:[%s317_s1] sm:$0xff]  ;;  %s199_s1 = smov [#allocation2]  }
   0x8   :  { %v15_v16 = vld [vmem:[%s316_s0] sm:$0xff]  ;;  %v16_v17 = vld [vmem:[%s316_s0 + $0x8] sm:$0xff]  ;;  %s121_s23 = sshll.u32 %s199_s1, 4  ;;  %s200_s0 = smov 128   ;;  %s122_s23 = int_to_ptr.vmem [resolvable:$true] %s121_s23 }
   0x9   :  { %v172_v18 = vld [vmem:[%s318_s2] ss:$0 sm:$0xff] }
   0xa   :  { %137 = vmatpush.xpose.msk.msra.mxu0 %vm37_vm0, %v30_v2  ;;  %155 = vmatpush.xpose.msk.msra.mxu1 %vm37_vm0, %v30_v2 }
   0xe   :  { %138 = vmatpush.xpose.msk.msra.mxu0 %vm37_vm0, %v29_v3  ;;  %156 = vmatpush.xpose.msk.msra.mxu1 %vm37_vm0, %v29_v3 }
  0x12   :  { %139 = vmatpush.xpose.msk.msra.mxu0 %vm37_vm0, %v28_v4  ;;  %157 = vmatpush.xpose.msk.msra.mxu1 %vm37_vm0, %v28_v4 }
  0x16   :  { %140 = vmatpush.xpose.msk.msra.mxu0 %vm37_vm0, %v27_v5  ;;  %158 = vmatpush.xpose.msk.msra.mxu1 %vm37_vm0, %v27_v5 }
  0x1a   :  { %141 = vmatpush.xpose.msk.msra.mxu0 %vm37_vm0, %v26_v6  ;;  %159 = vmatpush.xpose.msk.msra.mxu1 %vm37_vm0, %v26_v6 }
  0x1e   :  { %142 = vmatpush.xpose.msk.msra.mxu0 %vm37_vm0, %v25_v7  ;;  %160 = vmatpush.xpose.msk.msra.mxu1 %vm37_vm0, %v25_v7 }
  0x22   :  { %143 = vmatpush.xpose.msk.msra.mxu0 %vm37_vm0, %v24_v8  ;;  %161 = vmatpush.xpose.msk.msra.mxu1 %vm37_vm0, %v24_v8 }
  0x26   :  { %144 = vmatpush.xpose.msk.msra.mxu0 %vm37_vm0, %v23_v9  ;;  %162 = vmatpush.xpose.msk.msra.mxu1 %vm37_vm0, %v23_v9 }
  0x2a   :  { %145 = vmatpush.xpose.msk.msra.mxu0 %vm37_vm0, %v22_v10  ;;  %163 = vmatpush.xpose.msk.msra.mxu1 %vm37_vm0, %v22_v10 }
  0x2e   :  { %146 = vmatpush.xpose.msk.msra.mxu0 %vm37_vm0, %v21_v11  ;;  %164 = vmatpush.xpose.msk.msra.mxu1 %vm37_vm0, %v21_v11 }
  0x32   :  { %147 = vmatpush.xpose.msk.msra.mxu0 %vm37_vm0, %v20_v12  ;;  %165 = vmatpush.xpose.msk.msra.mxu1 %vm37_vm0, %v20_v12 }
  0x36   :  { %148 = vmatpush.xpose.msk.msra.mxu0 %vm37_vm0, %v19_v13  ;;  %166 = vmatpush.xpose.msk.msra.mxu1 %vm37_vm0, %v19_v13 }
  0x3a   :  { %149 = vmatpush.xpose.msk.msra.mxu0 %vm37_vm0, %v18_v14  ;;  %167 = vmatpush.xpose.msk.msra.mxu1 %vm37_vm0, %v18_v14 }
  0x3e   :  { %150 = vmatpush.xpose.msk.msra.mxu0 %vm37_vm0, %v17_v15  ;;  %168 = vmatpush.xpose.msk.msra.mxu1 %vm37_vm0, %v17_v15 }
  0x41   :  { %151 = vmatmul.msk.f32.vlgmr.msra.gmra.mxu0 %vm37_vm0, %v15_v16  ;;  %152 = vmatmul.msk.f32.vlgmr.msra.gmra.mxu1 %vm37_vm0, %v16_v17 }
  0xbe   :  { %v109_v19 = vpop.f32.mrf.mxu0  ;;  %v112_v20 = vpop.f32.mrf.mxu1 }
  0xbf   :  { %v110_v21 = vadd.f32 %v172_v18, %v109_v19  ;;  %v113_v22 = vadd.f32 %v172_v18, %v112_v20 }
  0xc1   :  { %115 = vst [vmem:[#allocation2] sm:$0xff] %v110_v21 }
  0xc2   :  { %116 = vst [vmem:[#allocation2 + $0x8] sm:$0xff] %v113_v22 }
  0xc3   :  { %129 = dma.vmem_to_hbm [thread:$0]  %s122_s23, 256, %s124_s26, [#allocation3], %s200_s0, %s200_s0, %s201_s27  }
  0xc4   :  { %197 = dma.done.wait [#allocation3], 256  }
  0xc5   :  { %198 = vsyncadd [#allocation3], 4294967040 }
  0xc6   :  { %134 = vsyncpa [#allocation3], 1 }

</bundles_post_ra>
